<compile_context>
chip_gen: v7x
topology: tpu7x:2x2x1
jax: 0.10.0
libtpu: 0.0.40
codegen_flags: <defaults>
</compile_context>

<pallas_src>
import functools

import jax
import jax.numpy as jnp
import numpy as np
from jax.experimental import pallas as pl
from jax.experimental.pallas import tpu as pltpu

WIN_SIZE = 11
WIN_SIGMA = 1.5
K1, K2 = 0.01, 0.03


def _gaussian_window(win_size=WIN_SIZE, sigma=WIN_SIGMA):
    # Same construction as pytorch_msssim._fspecial_gauss_1d
    coords = np.arange(win_size, dtype=np.float64) - win_size // 2
    g = np.exp(-(coords ** 2) / (2.0 * sigma ** 2))
    g /= g.sum()
    return g.astype(np.float32)


def _round_up(x, m):
    return ((x + m - 1) // m) * m


def _filter_matrices(H, W, dtype):
    """A (Ho, H): row pass.  B (W_pad, Wo_pad): lane-padded column pass shared
    by all five maps (rows >= W and columns >= Wo are zero)."""
    g = _gaussian_window()
    win = WIN_SIZE
    Ho, Wo = H - win + 1, W - win + 1
    W_pad, Wo_pad = _round_up(W, 128), _round_up(Wo, 128)
    A = np.zeros((Ho, H), dtype=np.float32)
    for i in range(Ho):
        A[i, i:i + win] = g
    B = np.zeros((W_pad, Wo_pad), dtype=np.float32)
    for j in range(Wo):
        B[j:j + win, j] = g
    return (jnp.asarray(A, dtype=dtype), jnp.asarray(B, dtype=dtype),
            Ho, Wo, W_pad, Wo_pad)


def _ssim_group_kernel(pred_ref, true_ref, a_ref, b_ref, out_ref, *,
                       g_imgs, nc_total, h, w, w_pad, ho, wo, wo_pad,
                       inv_count, c1, c2, mm_dtype):
    # pred_ref/true_ref : (G, H, W) image blocks in VMEM
    # a_ref : (Ho, H)        row-pass band matrix   (resident, mm_dtype)
    # b_ref : (W_pad, Wo_pad) column-pass band matrix (resident, mm_dtype)
    # out_ref : (1, 1, 128) lane-dense per-group output block
    a_mat = a_ref[...]
    b_mat = b_ref[...]

    pad = w_pad - w
    zpad = jnp.zeros((h, pad), dtype=mm_dtype) if pad else None  # hoisted

    # Build the fused row-pass RHS: 5 maps per image, each lane-padded to W_pad,
    # concatenated along lanes (all seams land on 128-lane boundaries).
    segs = []
    for g in range(g_imgs):
        x = pred_ref[g].astype(jnp.float32)      # (H, W)
        y = true_ref[g].astype(jnp.float32)
        for m in (x, y, x * x, y * y, x * y):    # products computed in f32 (VPU)
            m = m.astype(mm_dtype)
            if pad:
                m = jnp.concatenate([m, zpad], axis=1)
            segs.append(m)
    zcat = jnp.concatenate(segs, axis=1)                           # (H, 5*G*W_pad)

    # Row pass: one big MXU matmul with f32 accumulation.
    t = jnp.dot(a_mat, zcat, preferred_element_type=jnp.float32)   # (Ho, 5*G*W_pad)
    t_mm = t.astype(mm_dtype)

    lane = jax.lax.broadcasted_iota(jnp.int32, (ho, wo_pad), 1)
    valid_lane = lane < wo                       # mask zero-padded output lanes
    group_start = pl.program_id(0) * g_imgs

    total = jnp.float32(0.0)
    for g in range(g_imgs):
        base = 5 * g * w_pad

        def col(k, _base=base):
            seg = t_mm[:, _base + k * w_pad:_base + (k + 1) * w_pad]
            return jnp.dot(seg, b_mat, preferred_element_type=jnp.float32)

        mu1, mu2, e_x2, e_y2, e_xy = col(0), col(1), col(2), col(3), col(4)

        mu1_sq = mu1 * mu1
        mu2_sq = mu2 * mu2
        mu1_mu2 = mu1 * mu2
        sigma1_sq = e_x2 - mu1_sq
        sigma2_sq = e_y2 - mu2_sq
        sigma12 = e_xy - mu1_mu2

        num = (2.0 * mu1_mu2 + c1) * (2.0 * sigma12 + c2)
        den = (mu1_sq + mu2_sq + c1) * (sigma1_sq + sigma2_sq + c2)
        ssim_map = num * pl.reciprocal(den, approx=True)           # EUP slot

        ssim_mean = jnp.sum(jnp.where(valid_lane, ssim_map, 0.0)) * jnp.float32(inv_count)
        # Mask images that only exist because NC was padded to a multiple of G.
        is_real = (group_start + g) < nc_total
        total = total + jnp.where(is_real, ssim_mean, jnp.float32(0.0))

    out_ref[...] = jnp.full(out_ref.shape, total, dtype=jnp.float32)


def _pick_group_size(nc, h, w, w_pad, ho, in_itemsize, budget_bytes=8 << 20):
    """Images per grid step, sized so the group working set stays well inside
    the per-TensorCore VMEM budget on v5e/v6e/v7x."""
    per_img = (2 * 2 * h * w * in_itemsize      # pred+true block, double-buffered
               + 5 * h * w_pad * 2              # zcat (bf16)
               + 5 * ho * w_pad * (4 + 2))      # t (f32) + bf16 copy
    g = max(1, min(16, budget_bytes // max(per_img, 1)))
    return int(min(g, nc))


def ssim_loss(pred, true, *, scale=0.2, data_range=1.0, mm_dtype=jnp.bfloat16):
    """Pallas implementation of SSIMLoss.forward(pred, true)."""
    assert pred.shape == true.shape and pred.ndim == 4
    N, C, H, W = pred.shape
    assert H >= WIN_SIZE and W >= WIN_SIZE, "image smaller than SSIM window"
    # TODO(synk): for very large H/W (>=~512) the band matmuls still do mostly
    # multiply-by-zero work; swap to a pltpu.roll-based 11-tap shift-and-
    # accumulate separable filter (biggest payoff on v5e).

    A, B, Ho, Wo, W_pad, Wo_pad = _filter_matrices(H, W, mm_dtype)
    NC = N * C
    in_itemsize = jnp.dtype(pred.dtype).itemsize
    G = _pick_group_size(NC, H, W, W_pad, Ho, in_itemsize)
    num_groups = (NC + G - 1) // G
    NC_pad = num_groups * G

    pred2 = pred.reshape(NC, H, W)
    true2 = true.reshape(NC, H, W)
    if NC_pad > NC:
        padn = ((0, NC_pad - NC), (0, 0), (0, 0))
        pred2 = jnp.pad(pred2, padn)
        true2 = jnp.pad(true2, padn)

    kernel = functools.partial(
        _ssim_group_kernel,
        g_imgs=G, nc_total=NC, h=H, w=W, w_pad=W_pad, ho=Ho, wo=Wo,
        wo_pad=Wo_pad, inv_count=1.0 / float(Ho * Wo),
        c1=float((K1 * data_range) ** 2), c2=float((K2 * data_range) ** 2),
        mm_dtype=mm_dtype)

    grid_spec = pltpu.PrefetchScalarGridSpec(
        num_scalar_prefetch=0,
        grid=(num_groups,),
        in_specs=[
            pl.BlockSpec((G, H, W), lambda i: (i, 0, 0)),        # pred group i
            pl.BlockSpec((G, H, W), lambda i: (i, 0, 0)),        # true group i
            pl.BlockSpec((Ho, H), lambda i: (0, 0)),             # A (resident)
            pl.BlockSpec((W_pad, Wo_pad), lambda i: (0, 0)),     # B (resident)
        ],
        out_specs=pl.BlockSpec((1, 1, 128), lambda i: (i, 0, 0)),
    )

    # Per-TensorCore VMEM budget (inputs double-buffered, A/B resident,
    # zcat/t intermediates, per-image maps + algebra temporaries).
    mm_isz = jnp.dtype(mm_dtype).itemsize
    vmem_est = (2 * 2 * G * H * W * in_itemsize
                + 2 * (Ho * H + W_pad * Wo_pad) * mm_isz
                + 5 * G * H * W_pad * mm_isz
                + 5 * G * Ho * W_pad * (4 + mm_isz)
                + 12 * Ho * Wo_pad * 4
                + 2 * 128 * 4)
    vmem_limit = int(min(64 << 20, max(32 << 20, 2 * vmem_est)))

    cost = pl.CostEstimate(
        flops=int(2 * NC_pad * (Ho * H * 5 * W_pad + 5 * Ho * W_pad * Wo_pad)
                  + 14 * NC_pad * Ho * Wo_pad),
        transcendentals=int(NC_pad * Ho * Wo_pad),
        bytes_accessed=int(2 * NC_pad * H * W * in_itemsize
                           + (Ho * H + W_pad * Wo_pad) * mm_isz
                           + num_groups * 128 * 4),
    )

    per_group = pl.pallas_call(
        kernel,
        out_shape=jax.ShapeDtypeStruct((num_groups, 1, 128), jnp.float32),
        grid_spec=grid_spec,
        compiler_params=pltpu.CompilerParams(
            dimension_semantics=("parallel",),
            vmem_limit_bytes=vmem_limit),
        cost_estimate=cost,
    )(pred2, true2, A, B)

    ssim_mean = jnp.sum(per_group[:, 0, 0]) / jnp.float32(NC)
    return jnp.float32(scale) * (jnp.float32(1.0) - ssim_mean)


def _ssim_loss_ref(pred, true, scale=0.2, data_range=1.0):
    """Pure-JAX f32 reference (matches pytorch_msssim semantics)."""
    g = _gaussian_window()
    N, C, H, W = pred.shape
    win = WIN_SIZE
    Ho, Wo = H - win + 1, W - win + 1
    A = np.zeros((Ho, H), np.float32)
    for i in range(Ho):
        A[i, i:i + win] = g
    Bc = np.zeros((W, Wo), np.float32)
    for j in range(Wo):
        Bc[j:j + win, j] = g
    A = jnp.asarray(A)
    Bc = jnp.asarray(Bc)
    x = pred.reshape(-1, H, W).astype(jnp.float32)
    y = true.reshape(-1, H, W).astype(jnp.float32)

    def filt(z):
        return jnp.einsum('oh,nhw,wp->nop', A, z, Bc)

    mu1, mu2 = filt(x), filt(y)
    sigma1_sq = filt(x * x) - mu1 * mu1
    sigma2_sq = filt(y * y) - mu2 * mu2
    sigma12 = filt(x * y) - mu1 * mu2
    c1 = (K1 * data_range) ** 2
    c2 = (K2 * data_range) ** 2
    ssim_map = ((2 * mu1 * mu2 + c1) * (2 * sigma12 + c2)
                / ((mu1 * mu1 + mu2 * mu2 + c1) * (sigma1_sq + sigma2_sq + c2)))
    return scale * (1.0 - jnp.mean(ssim_map))


if __name__ == "__main__":
    key = jax.random.PRNGKey(0)
    k1, k2 = jax.random.split(key)
    # channel=1 (module default numchannels=1), data_range=1.0 -> inputs in [0, 1]
    pred = jax.random.uniform(k1, (2, 1, 16, 16), dtype=jnp.float32)
    true = jax.random.uniform(k2, (2, 1, 16, 16), dtype=jnp.float32)

    loss = ssim_loss(pred, true, scale=0.2, data_range=1.0)
    jax.block_until_ready(loss)
    assert loss.shape == () and bool(jnp.isfinite(loss))

    # Loose sanity check vs a pure-JAX f32 reference (bf16 matmul operands and
    # the approx reciprocal introduce only ~1e-3-level error on the loss).
    ref = _ssim_loss_ref(pred, true, scale=0.2, data_range=1.0)
    assert abs(float(loss) - float(ref)) < 2e-2, (float(loss), float(ref))
    print("KERNEL_OK")
</pallas_src>

<mosaic_0001>
module attributes {stable_mosaic.version = 11 : i64} {
  func.func @_ssim_group_kernel(%arg0: i32, %arg1: memref<2x16x16xf32, #tpu.memory_space<vmem>>, %arg2: memref<2x16x16xf32, #tpu.memory_space<vmem>>, %arg3: memref<6x16xbf16, #tpu.memory_space<vmem>>, %arg4: memref<128x128xbf16, #tpu.memory_space<vmem>>, %arg5: memref<1x1x128xf32, #tpu.memory_space<vmem>>) attributes {dimension_semantics = [#tpu.dimension_semantics<parallel>], iteration_bounds = array<i64: 1>, scalar_prefetch = 0 : i64, scratch_operands = 0 : i64, tpu.core_type = #tpu.core_type<tc>, window_params = [{transform_indices = @transform_0, window_bounds = array<i64: 2, 16, 16>}, {transform_indices = @transform_1, window_bounds = array<i64: 2, 16, 16>}, {pipeline_mode = #tpu.pipeline_mode<synchronous>, transform_indices = @transform_2, window_bounds = array<i64: 6, 16>}, {pipeline_mode = #tpu.pipeline_mode<synchronous>, transform_indices = @transform_3, window_bounds = array<i64: 128, 128>}, {transform_indices = @transform_4, window_bounds = array<i64: 1, 1, 128>}]} {
    %c0 = arith.constant 0 : index
    %c0_0 = arith.constant 0 : index
    %0 = vector.load %arg3[%c0, %c0_0] : memref<6x16xbf16, #tpu.memory_space<vmem>>, vector<6x16xbf16>
    %c0_1 = arith.constant 0 : index
    %c0_2 = arith.constant 0 : index
    %1 = vector.load %arg4[%c0_1, %c0_2] : memref<128x128xbf16, #tpu.memory_space<vmem>>, vector<128x128xbf16>
    %cst = arith.constant 0.000000e+00 : bf16
    %2 = vector.broadcast %cst : bf16 to vector<16x112xbf16>
    %c0_3 = arith.constant 0 : index
    %c0_4 = arith.constant 0 : index
    %c0_5 = arith.constant 0 : index
    %3 = vector.load %arg1[%c0_3, %c0_4, %c0_5] : memref<2x16x16xf32, #tpu.memory_space<vmem>>, vector<1x16x16xf32>
    %4 = vector.shape_cast %3 : vector<1x16x16xf32> to vector<16x16xf32>
    %c0_6 = arith.constant 0 : index
    %c0_7 = arith.constant 0 : index
    %c0_8 = arith.constant 0 : index
    %5 = vector.load %arg2[%c0_6, %c0_7, %c0_8] : memref<2x16x16xf32, #tpu.memory_space<vmem>>, vector<1x16x16xf32>
    %6 = vector.shape_cast %5 : vector<1x16x16xf32> to vector<16x16xf32>
    %7 = arith.mulf %4, %4 : vector<16x16xf32>
    %8 = arith.mulf %6, %6 : vector<16x16xf32>
    %9 = arith.mulf %4, %6 : vector<16x16xf32>
    %10 = arith.truncf %4 : vector<16x16xf32> to vector<16x16xbf16>
    %11 = tpu.concatenate %10, %2 in 1 : vector<16x16xbf16>, vector<16x112xbf16> -> vector<16x128xbf16>
    %12 = arith.truncf %6 : vector<16x16xf32> to vector<16x16xbf16>
    %13 = tpu.concatenate %12, %2 in 1 : vector<16x16xbf16>, vector<16x112xbf16> -> vector<16x128xbf16>
    %14 = arith.truncf %7 : vector<16x16xf32> to vector<16x16xbf16>
    %15 = tpu.concatenate %14, %2 in 1 : vector<16x16xbf16>, vector<16x112xbf16> -> vector<16x128xbf16>
    %16 = arith.truncf %8 : vector<16x16xf32> to vector<16x16xbf16>
    %17 = tpu.concatenate %16, %2 in 1 : vector<16x16xbf16>, vector<16x112xbf16> -> vector<16x128xbf16>
    %18 = arith.truncf %9 : vector<16x16xf32> to vector<16x16xbf16>
    %19 = tpu.concatenate %18, %2 in 1 : vector<16x16xbf16>, vector<16x112xbf16> -> vector<16x128xbf16>
    %c1 = arith.constant 1 : index
    %c0_9 = arith.constant 0 : index
    %c0_10 = arith.constant 0 : index
    %20 = vector.load %arg1[%c1, %c0_9, %c0_10] : memref<2x16x16xf32, #tpu.memory_space<vmem>>, vector<1x16x16xf32>
    %21 = vector.shape_cast %20 : vector<1x16x16xf32> to vector<16x16xf32>
    %c1_11 = arith.constant 1 : index
    %c0_12 = arith.constant 0 : index
    %c0_13 = arith.constant 0 : index
    %22 = vector.load %arg2[%c1_11, %c0_12, %c0_13] : memref<2x16x16xf32, #tpu.memory_space<vmem>>, vector<1x16x16xf32>
    %23 = vector.shape_cast %22 : vector<1x16x16xf32> to vector<16x16xf32>
    %24 = arith.mulf %21, %21 : vector<16x16xf32>
    %25 = arith.mulf %23, %23 : vector<16x16xf32>
    %26 = arith.mulf %21, %23 : vector<16x16xf32>
    %27 = arith.truncf %21 : vector<16x16xf32> to vector<16x16xbf16>
    %28 = tpu.concatenate %27, %2 in 1 : vector<16x16xbf16>, vector<16x112xbf16> -> vector<16x128xbf16>
    %29 = arith.truncf %23 : vector<16x16xf32> to vector<16x16xbf16>
    %30 = tpu.concatenate %29, %2 in 1 : vector<16x16xbf16>, vector<16x112xbf16> -> vector<16x128xbf16>
    %31 = arith.truncf %24 : vector<16x16xf32> to vector<16x16xbf16>
    %32 = tpu.concatenate %31, %2 in 1 : vector<16x16xbf16>, vector<16x112xbf16> -> vector<16x128xbf16>
    %33 = arith.truncf %25 : vector<16x16xf32> to vector<16x16xbf16>
    %34 = tpu.concatenate %33, %2 in 1 : vector<16x16xbf16>, vector<16x112xbf16> -> vector<16x128xbf16>
    %35 = arith.truncf %26 : vector<16x16xf32> to vector<16x16xbf16>
    %36 = tpu.concatenate %35, %2 in 1 : vector<16x16xbf16>, vector<16x112xbf16> -> vector<16x128xbf16>
    %37 = tpu.concatenate %11, %13, %15, %17, %19, %28, %30, %32, %34, %36 in 1 : vector<16x128xbf16>, vector<16x128xbf16>, vector<16x128xbf16>, vector<16x128xbf16>, vector<16x128xbf16>, vector<16x128xbf16>, vector<16x128xbf16>, vector<16x128xbf16>, vector<16x128xbf16>, vector<16x128xbf16> -> vector<16x1280xbf16>
    %cst_14 = arith.constant dense<0.000000e+00> : vector<6x1280xf32>
    %38 = tpu.matmul %0, %37, %cst_14 {dimension_numbers = #tpu.dot_dimension_numbers<[1], [0], [0], [1], [0, 0, 1, 1], [], []>} : vector<6x16xbf16>, vector<16x1280xbf16>, vector<6x1280xf32> -> vector<6x1280xf32>
    %39 = arith.truncf %38 : vector<6x1280xf32> to vector<6x1280xbf16>
    %40 = tpu.iota {dimensions = array<i32: 1>} : vector<6x128xi32>
    %c6_i32 = arith.constant 6 : i32
    %41 = vector.broadcast %c6_i32 : i32 to vector<6x128xi32>
    %42 = arith.cmpi slt, %40, %41 : vector<6x128xi32>
    %c2_i32 = arith.constant 2 : i32
    %43 = arith.muli %arg0, %c2_i32 : i32
    %44 = vector.extract_strided_slice %39 {offsets = [0, 0], sizes = [6, 128], strides = [1, 1]} : vector<6x1280xbf16> to vector<6x128xbf16>
    %cst_15 = arith.constant dense<0.000000e+00> : vector<6x128xf32>
    %45 = tpu.matmul %44, %1, %cst_15 {dimension_numbers = #tpu.dot_dimension_numbers<[1], [0], [0], [1], [0, 0, 1, 1], [], []>} : vector<6x128xbf16>, vector<128x128xbf16>, vector<6x128xf32> -> vector<6x128xf32>
    %46 = vector.extract_strided_slice %39 {offsets = [0, 128], sizes = [6, 128], strides = [1, 1]} : vector<6x1280xbf16> to vector<6x128xbf16>
    %cst_16 = arith.constant dense<0.000000e+00> : vector<6x128xf32>
    %47 = tpu.matmul %46, %1, %cst_16 {dimension_numbers = #tpu.dot_dimension_numbers<[1], [0], [0], [1], [0, 0, 1, 1], [], []>} : vector<6x128xbf16>, vector<128x128xbf16>, vector<6x128xf32> -> vector<6x128xf32>
    %48 = vector.extract_strided_slice %39 {offsets = [0, 256], sizes = [6, 128], strides = [1, 1]} : vector<6x1280xbf16> to vector<6x128xbf16>
    %cst_17 = arith.constant dense<0.000000e+00> : vector<6x128xf32>
    %49 = tpu.matmul %48, %1, %cst_17 {dimension_numbers = #tpu.dot_dimension_numbers<[1], [0], [0], [1], [0, 0, 1, 1], [], []>} : vector<6x128xbf16>, vector<128x128xbf16>, vector<6x128xf32> -> vector<6x128xf32>
    %50 = vector.extract_strided_slice %39 {offsets = [0, 384], sizes = [6, 128], strides = [1, 1]} : vector<6x1280xbf16> to vector<6x128xbf16>
    %cst_18 = arith.constant dense<0.000000e+00> : vector<6x128xf32>
    %51 = tpu.matmul %50, %1, %cst_18 {dimension_numbers = #tpu.dot_dimension_numbers<[1], [0], [0], [1], [0, 0, 1, 1], [], []>} : vector<6x128xbf16>, vector<128x128xbf16>, vector<6x128xf32> -> vector<6x128xf32>
    %52 = vector.extract_strided_slice %39 {offsets = [0, 512], sizes = [6, 128], strides = [1, 1]} : vector<6x1280xbf16> to vector<6x128xbf16>
    %cst_19 = arith.constant dense<0.000000e+00> : vector<6x128xf32>
    %53 = tpu.matmul %52, %1, %cst_19 {dimension_numbers = #tpu.dot_dimension_numbers<[1], [0], [0], [1], [0, 0, 1, 1], [], []>} : vector<6x128xbf16>, vector<128x128xbf16>, vector<6x128xf32> -> vector<6x128xf32>
    %54 = arith.mulf %45, %45 : vector<6x128xf32>
    %55 = arith.mulf %47, %47 : vector<6x128xf32>
    %56 = arith.mulf %45, %47 : vector<6x128xf32>
    %57 = arith.subf %49, %54 : vector<6x128xf32>
    %58 = arith.subf %51, %55 : vector<6x128xf32>
    %59 = arith.subf %53, %56 : vector<6x128xf32>
    %cst_20 = arith.constant 2.000000e+00 : f32
    %60 = vector.broadcast %cst_20 : f32 to vector<6x128xf32>
    %61 = arith.mulf %60, %56 : vector<6x128xf32>
    %cst_21 = arith.constant 9.99999974E-5 : f32
    %62 = vector.broadcast %cst_21 : f32 to vector<6x128xf32>
    %63 = arith.addf %61, %62 : vector<6x128xf32>
    %cst_22 = arith.constant 2.000000e+00 : f32
    %64 = vector.broadcast %cst_22 : f32 to vector<6x128xf32>
    %65 = arith.mulf %64, %59 : vector<6x128xf32>
    %cst_23 = arith.constant 8.99999984E-4 : f32
    %66 = vector.broadcast %cst_23 : f32 to vector<6x128xf32>
    %67 = arith.addf %65, %66 : vector<6x128xf32>
    %68 = arith.mulf %63, %67 : vector<6x128xf32>
    %69 = arith.addf %54, %55 : vector<6x128xf32>
    %cst_24 = arith.constant 9.99999974E-5 : f32
    %70 = vector.broadcast %cst_24 : f32 to vector<6x128xf32>
    %71 = arith.addf %69, %70 : vector<6x128xf32>
    %72 = arith.addf %57, %58 : vector<6x128xf32>
    %cst_25 = arith.constant 8.99999984E-4 : f32
    %73 = vector.broadcast %cst_25 : f32 to vector<6x128xf32>
    %74 = arith.addf %72, %73 : vector<6x128xf32>
    %75 = arith.mulf %71, %74 : vector<6x128xf32>
    %76 = tpu.reciprocal %75 {approx = true} : vector<6x128xf32> -> vector<6x128xf32>
    %77 = arith.mulf %68, %76 : vector<6x128xf32>
    %cst_26 = arith.constant 0.000000e+00 : f32
    %78 = vector.broadcast %cst_26 : f32 to vector<6x128xf32>
    %79 = arith.select %42, %77, %78 : vector<6x128xi1>, vector<6x128xf32>
    %80 = vector.shape_cast %79 : vector<6x128xf32> to vector<1x6x128xf32>
    %cst_27 = arith.constant dense<0.000000e+00> : vector<1xf32>
    %81 = vector.multi_reduction <add>, %80, %cst_27 [1, 2] : vector<1x6x128xf32> to vector<1xf32>
    %82 = vector.shape_cast %81 : vector<1xf32> to vector<1x1x1xf32>
    %83 = vector.extract %82[0, 0, 0] : f32 from vector<1x1x1xf32>
    %cst_28 = arith.constant 0.027777778 : f32
    %84 = arith.mulf %83, %cst_28 : f32
    %c0_i32 = arith.constant 0 : i32
    %85 = arith.addi %43, %c0_i32 : i32
    %c2_i32_29 = arith.constant 2 : i32
    %86 = arith.cmpi slt, %85, %c2_i32_29 : i32
    %cst_30 = arith.constant 0.000000e+00 : f32
    %87 = arith.select %86, %84, %cst_30 : f32
    %cst_31 = arith.constant 0.000000e+00 : f32
    %88 = arith.addf %cst_31, %87 : f32
    %89 = vector.extract_strided_slice %39 {offsets = [0, 640], sizes = [6, 128], strides = [1, 1]} : vector<6x1280xbf16> to vector<6x128xbf16>
    %cst_32 = arith.constant dense<0.000000e+00> : vector<6x128xf32>
    %90 = tpu.matmul %89, %1, %cst_32 {dimension_numbers = #tpu.dot_dimension_numbers<[1], [0], [0], [1], [0, 0, 1, 1], [], []>} : vector<6x128xbf16>, vector<128x128xbf16>, vector<6x128xf32> -> vector<6x128xf32>
    %91 = vector.extract_strided_slice %39 {offsets = [0, 768], sizes = [6, 128], strides = [1, 1]} : vector<6x1280xbf16> to vector<6x128xbf16>
    %cst_33 = arith.constant dense<0.000000e+00> : vector<6x128xf32>
    %92 = tpu.matmul %91, %1, %cst_33 {dimension_numbers = #tpu.dot_dimension_numbers<[1], [0], [0], [1], [0, 0, 1, 1], [], []>} : vector<6x128xbf16>, vector<128x128xbf16>, vector<6x128xf32> -> vector<6x128xf32>
    %93 = vector.extract_strided_slice %39 {offsets = [0, 896], sizes = [6, 128], strides = [1, 1]} : vector<6x1280xbf16> to vector<6x128xbf16>
    %cst_34 = arith.constant dense<0.000000e+00> : vector<6x128xf32>
    %94 = tpu.matmul %93, %1, %cst_34 {dimension_numbers = #tpu.dot_dimension_numbers<[1], [0], [0], [1], [0, 0, 1, 1], [], []>} : vector<6x128xbf16>, vector<128x128xbf16>, vector<6x128xf32> -> vector<6x128xf32>
    %95 = vector.extract_strided_slice %39 {offsets = [0, 1024], sizes = [6, 128], strides = [1, 1]} : vector<6x1280xbf16> to vector<6x128xbf16>
    %cst_35 = arith.constant dense<0.000000e+00> : vector<6x128xf32>
    %96 = tpu.matmul %95, %1, %cst_35 {dimension_numbers = #tpu.dot_dimension_numbers<[1], [0], [0], [1], [0, 0, 1, 1], [], []>} : vector<6x128xbf16>, vector<128x128xbf16>, vector<6x128xf32> -> vector<6x128xf32>
    %97 = vector.extract_strided_slice %39 {offsets = [0, 1152], sizes = [6, 128], strides = [1, 1]} : vector<6x1280xbf16> to vector<6x128xbf16>
    %cst_36 = arith.constant dense<0.000000e+00> : vector<6x128xf32>
    %98 = tpu.matmul %97, %1, %cst_36 {dimension_numbers = #tpu.dot_dimension_numbers<[1], [0], [0], [1], [0, 0, 1, 1], [], []>} : vector<6x128xbf16>, vector<128x128xbf16>, vector<6x128xf32> -> vector<6x128xf32>
    %99 = arith.mulf %90, %90 : vector<6x128xf32>
    %100 = arith.mulf %92, %92 : vector<6x128xf32>
    %101 = arith.mulf %90, %92 : vector<6x128xf32>
    %102 = arith.subf %94, %99 : vector<6x128xf32>
    %103 = arith.subf %96, %100 : vector<6x128xf32>
    %104 = arith.subf %98, %101 : vector<6x128xf32>
    %cst_37 = arith.constant 2.000000e+00 : f32
    %105 = vector.broadcast %cst_37 : f32 to vector<6x128xf32>
    %106 = arith.mulf %105, %101 : vector<6x128xf32>
    %cst_38 = arith.constant 9.99999974E-5 : f32
    %107 = vector.broadcast %cst_38 : f32 to vector<6x128xf32>
    %108 = arith.addf %106, %107 : vector<6x128xf32>
    %cst_39 = arith.constant 2.000000e+00 : f32
    %109 = vector.broadcast %cst_39 : f32 to vector<6x128xf32>
    %110 = arith.mulf %109, %104 : vector<6x128xf32>
    %cst_40 = arith.constant 8.99999984E-4 : f32
    %111 = vector.broadcast %cst_40 : f32 to vector<6x128xf32>
    %112 = arith.addf %110, %111 : vector<6x128xf32>
    %113 = arith.mulf %108, %112 : vector<6x128xf32>
    %114 = arith.addf %99, %100 : vector<6x128xf32>
    %cst_41 = arith.constant 9.99999974E-5 : f32
    %115 = vector.broadcast %cst_41 : f32 to vector<6x128xf32>
    %116 = arith.addf %114, %115 : vector<6x128xf32>
    %117 = arith.addf %102, %103 : vector<6x128xf32>
    %cst_42 = arith.constant 8.99999984E-4 : f32
    %118 = vector.broadcast %cst_42 : f32 to vector<6x128xf32>
    %119 = arith.addf %117, %118 : vector<6x128xf32>
    %120 = arith.mulf %116, %119 : vector<6x128xf32>
    %121 = tpu.reciprocal %120 {approx = true} : vector<6x128xf32> -> vector<6x128xf32>
    %122 = arith.mulf %113, %121 : vector<6x128xf32>
    %cst_43 = arith.constant 0.000000e+00 : f32
    %123 = vector.broadcast %cst_43 : f32 to vector<6x128xf32>
    %124 = arith.select %42, %122, %123 : vector<6x128xi1>, vector<6x128xf32>
    %125 = vector.shape_cast %124 : vector<6x128xf32> to vector<1x6x128xf32>
    %cst_44 = arith.constant dense<0.000000e+00> : vector<1xf32>
    %126 = vector.multi_reduction <add>, %125, %cst_44 [1, 2] : vector<1x6x128xf32> to vector<1xf32>
    %127 = vector.shape_cast %126 : vector<1xf32> to vector<1x1x1xf32>
    %128 = vector.extract %127[0, 0, 0] : f32 from vector<1x1x1xf32>
    %cst_45 = arith.constant 0.027777778 : f32
    %129 = arith.mulf %128, %cst_45 : f32
    %c1_i32 = arith.constant 1 : i32
    %130 = arith.addi %43, %c1_i32 : i32
    %c2_i32_46 = arith.constant 2 : i32
    %131 = arith.cmpi slt, %130, %c2_i32_46 : i32
    %cst_47 = arith.constant 0.000000e+00 : f32
    %132 = arith.select %131, %129, %cst_47 : f32
    %133 = arith.addf %88, %132 : f32
    %134 = vector.broadcast %133 : f32 to vector<1x1x128xf32>
    %c0_48 = arith.constant 0 : index
    %c0_49 = arith.constant 0 : index
    %c0_50 = arith.constant 0 : index
    %135 = vector.load %arg5[%c0_48, %c0_49, %c0_50] : memref<1x1x128xf32, #tpu.memory_space<vmem>>, vector<1x1x128xf32>
    tpu.vector_store %arg5[%c0_48, %c0_49, %c0_50], %134 {strides = array<i32>} : memref<1x1x128xf32, #tpu.memory_space<vmem>>, vector<1x1x128xf32>,
    return
  }
  func.func @transform_0(%arg0: i32) -> (i32, i32, i32) {
    %c0_i32 = arith.constant 0 : i32
    %c0_i32_0 = arith.constant 0 : i32
    %c0_i32_1 = arith.constant 0 : i32
    return %arg0, %c0_i32, %c0_i32_0 : i32, i32, i32
  }
  func.func @transform_1(%arg0: i32) -> (i32, i32, i32) {
    %c0_i32 = arith.constant 0 : i32
    %c0_i32_0 = arith.constant 0 : i32
    %c0_i32_1 = arith.constant 0 : i32
    return %arg0, %c0_i32, %c0_i32_0 : i32, i32, i32
  }
  func.func @transform_2(%arg0: i32) -> (i32, i32) {
    %c0_i32 = arith.constant 0 : i32
    %c0_i32_0 = arith.constant 0 : i32
    %c0_i32_1 = arith.constant 0 : i32
    return %c0_i32, %c0_i32_0 : i32, i32
  }
  func.func @transform_3(%arg0: i32) -> (i32, i32) {
    %c0_i32 = arith.constant 0 : i32
    %c0_i32_0 = arith.constant 0 : i32
    %c0_i32_1 = arith.constant 0 : i32
    return %c0_i32, %c0_i32_0 : i32, i32
  }
  func.func @transform_4(%arg0: i32) -> (i32, i32, i32) {
    %c0_i32 = arith.constant 0 : i32
    %c0_i32_0 = arith.constant 0 : i32
    %c0_i32_1 = arith.constant 0 : i32
    return %arg0, %c0_i32, %c0_i32_0 : i32, i32, i32
  }
}

</mosaic_0001>

<bundles_post_ra>
// kernel: tpu_custom_call.1
= control target key start
LH: loop header
LB: loop body
LE: loop exit
PB: predicated region body
PF: predicated region fallthrough
CT: control target
= control target key end

     0   :  { %9 = vsyncpa [#allocation3], 0  ;;  %s1659_s0 = inlined_call_operand.hbm [shape: f32[2,16,16], index: 0, kind: input, shape index: {}]   ;;  %s1660_s1 = inlined_call_operand.hbm [shape: f32[2,16,16], index: 1, kind: input, shape index: {}]   ;;  %s1661_s2 = inlined_call_operand.vmem [shape: bf16[6,16], index: 2, kind: input, shape index: {}]   ;;  %s1662_s3 = inlined_call_operand.hbm [shape: bf16[128,128], index: 3, kind: input, shape index: {}]   ;;  %s1663_s4 = inlined_call_operand.hbm [shape: f32[1,1,128], index: 4, kind: output, shape index: {}]  }
   0x1   :  { %10 = vsyncpa [#allocation6], 0 }
   0x2   :  { %11 = vsyncpa [#allocation4], 0  ;;  %s1326_s15 = smov [#allocation5]   ;;  %s1327_s17 = smov [#allocation2]  }
   0x3   :  { %s29_s16 = sshll.u32 %s1326_s15, 4  ;;  %s17_s18 = sshll.u32 %s1327_s17, 4  ;;  %s30_s16 = int_to_ptr.vmem [resolvable:$true] %s29_s16  ;;  %s1362_s18 = int_to_ptr.vmem [resolvable:$true] %s17_s18 }
   0x4   :  { %s1232_s21 = scalar_lea.hbm %s1660_s1, 512 }
   0x5   :  { %p1233_p0 = scmp.ne.s32.totalorder %s1660_s1, %s1232_s21  ;;  %p1236_p1 = scmp.lt.u32.totalorder %s1232_s21, %s1660_s1 }
   0x7   :  { %p1238_p2 = pnand %p1236_p1, %p1233_p0 }
   0x9   :  { %1241 = shalt.err (!%p1238_p2)
}
   0xa   :  { %s1242_s26 = scalar_lea.vmem %s30_s16, 512  ;;  %p1247_p4 = scmp.lt.s32.totalorder %s30_s16, %s30_s16 }
   0xb   :  { %p1243_p3 = scmp.ne.s32.totalorder %s30_s16, %s1242_s26  ;;  %p1248_p5 = scmp.lt.s32.totalorder %s1242_s26, %s1242_s26 }
   0xd   :  { %p1249_p6 = por %p1248_p5, %p1247_p4 }
   0xf   :  { %p1250_p7 = pnand %p1249_p6, %p1243_p3 }
  0x11   :  { %1253 = shalt.err (!%p1250_p7)
}
  0x12   :  { %s1328_s27 = smov 128   ;;  %s1329_s28 = smov 8  }
  0x13   :  { %35 = dma.hbm_to_vmem [thread:$0]  %s1660_s1, 512, %s30_s16, [#allocation6], %s1328_s27, %s1328_s27, %s1329_s28  }
  0x14   :  { %s1254_s7 = scalar_lea.hbm %s1659_s0, 512 }
  0x15   :  { %p1255_p8 = scmp.ne.s32.totalorder %s1659_s0, %s1254_s7  ;;  %p1258_p9 = scmp.lt.u32.totalorder %s1254_s7, %s1659_s0 }
  0x17   :  { %p1260_p10 = pnand %p1258_p9, %p1255_p8 }
  0x19   :  { %1263 = shalt.err (!%p1260_p10)
}
  0x1a   :  { %s1264_s12 = scalar_lea.vmem %s1362_s18, 512  ;;  %p1269_p12 = scmp.lt.s32.totalorder %s1362_s18, %s1362_s18 }
  0x1b   :  { %p1265_p11 = scmp.ne.s32.totalorder %s1362_s18, %s1264_s12  ;;  %p1270_p13 = scmp.lt.s32.totalorder %s1264_s12, %s1264_s12 }
  0x1d   :  { %p1271_p0 = por %p1270_p13, %p1269_p12 }
  0x1f   :  { %p1272_p1 = pnand %p1271_p0, %p1265_p11 }
  0x21   :  { %1275 = shalt.err (!%p1272_p1)
}
  0x22   :  { %23 = dma.hbm_to_vmem [thread:$0]  %s1659_s0, 512, %s1362_s18, [#allocation3], %s1328_s27, %s1328_s27, %s1329_s28  }
  0x23   :  { %s1330_s14 = smov [#allocation7]   ;;  %s1276_s19 = scalar_lea.hbm %s1662_s3, 1024 }
  0x24   :  { %s43_s15 = sshll.u32 %s1330_s14, 4  ;;  %p1277_p2 = scmp.ne.s32.totalorder %s1662_s3, %s1276_s19  ;;  %s44_s15 = int_to_ptr.vmem [resolvable:$true] %s43_s15 }
  0x25   :  { %p1280_p3 = scmp.lt.u32.totalorder %s1276_s19, %s1662_s3 }
  0x27   :  { %p1282_p4 = pnand %p1280_p3, %p1277_p2 }
  0x29   :  { %1285 = shalt.err (!%p1282_p4)
}
  0x2a   :  { %s1286_s24 = scalar_lea.vmem %s44_s15, 1024  ;;  %p1291_p6 = scmp.lt.s32.totalorder %s44_s15, %s44_s15 }
  0x2b   :  { %p1287_p5 = scmp.ne.s32.totalorder %s44_s15, %s1286_s24  ;;  %p1292_p7 = scmp.lt.s32.totalorder %s1286_s24, %s1286_s24 }
  0x2d   :  { %p1293_p8 = por %p1292_p7, %p1291_p6 }
  0x2f   :  { %p1294_p9 = pnand %p1293_p8, %p1287_p5 }
  0x31   :  { %1297 = shalt.err (!%p1294_p9)
}
  0x32   :  { %s1331_s0 = smov 64   ;;  %s1332_s18 = smov 4  }
  0x33   :  { %49 = dma.hbm_to_vmem [thread:$0]  %s1662_s3, 1024, %s44_s15, [#allocation6], %s1331_s0, %s1331_s0, %s1332_s18  }
  0x34   :  { %1320 = dma.done.wait [#allocation3], 512  }
  0x35   :  { %1321 = vsyncadd [#allocation3], 4294966784 }
  0x36   :  { %1322 = dma.done.wait [#allocation6], 1536  }
  0x37   :  { %1323 = vsyncadd [#allocation6], 4294965760  ;;  %v1333_v0 = vmov 0   ;;  %v79_v1 = vld [vmem:[#allocation5] sm:$0xff]  ;;  %v80_v2 = vld [vmem:[#allocation5 + $0x8] sm:$0xff]  ;;  %vm88_vm0 = vcmask 130048  }
  0x38   :  { %176 = vmatprep.mubr.bf16.mxu0 %v1333_v0  ;;  %217 = vmatprep.mubr.bf16.mxu1 %v1333_v0  ;;  %v77_v3 = vld [vmem:[#allocation2] sm:$0xff]  ;;  %v93_v4 = vpack.c.bf16 %v80_v2, %v79_v1  ;;  %v78_v5 = vld [vmem:[#allocation2 + $0x8] sm:$0xff]  ;;  %v83_v7 = vmul.f32 %v79_v1, %v79_v1  ;;  %v84_v8 = vmul.f32 %v80_v2, %v80_v2  ;;  %v110_v9 = vld [vmem:[#allocation2 + $0x10] sm:$0xff]  ;;  %v1334_v36 = vmov 0.0   ;;  %s1336_s5 = smov [#allocation8]  }
  0x39   :  { %v85_v6 = vmul.f32 %v79_v1, %v77_v3  ;;  %v86_v10 = vmul.f32 %v80_v2, %v78_v5  ;;  %v87_v11 = vpack.c.bf16 %v78_v5, %v77_v3  ;;  %v81_v12 = vmul.f32 %v77_v3, %v77_v3  ;;  %v111_v14 = vld [vmem:[#allocation2 + $0x18] sm:$0xff]  ;;  %v113_v15 = vld [vmem:[#allocation5 + $0x10] sm:$0xff]  ;;  %v60_v25 = vld [vmem:[%s1661_s2] sm:$0x7]  ;;  %s887_s6 = sshll.u32 %s1336_s5, 4  ;;  %s888_s6 = int_to_ptr.vmem [resolvable:$true] %s887_s6 }
  0x3a   :  { %v82_v13 = vmul.f32 %v78_v5, %v78_v5  ;;  %v114_v16 = vld [vmem:[#allocation5 + $0x18] sm:$0xff]  ;;  %897 = vmatprep.subr.msk.bf16.mxu0 %vm88_vm0, %v93_v4  ;;  %v101_v17 = vpack.c.bf16 %v84_v8, %v83_v7  ;;  %v121_v18 = vpack.c.bf16 %v111_v14, %v110_v9  ;;  %v115_v19 = vmul.f32 %v110_v9, %v110_v9  ;;  %v1421_v38 = vld [vmem:[#allocation7] sm:$0xff]   ;;  %v1427_v39 = vld [vmem:[#allocation7 + $0x8] sm:$0xff]   ;;  %s1298_s8 = scalar_lea.vmem %s888_s6, 16  ;;  %s1302_s9 = scalar_lea.vmem %s888_s6, 32 }
  0x3b   :  { %v116_v20 = vmul.f32 %v111_v14, %v111_v14  ;;  %v91_v21 = vsel %vm88_vm0, %v87_v11, 0  ;;  %v105_v23 = vpack.c.bf16 %v86_v10, %v85_v6  ;;  %v125_v24 = vpack.c.bf16 %v114_v16, %v113_v15  ;;  %v1431_v40 = vld [vmem:[#allocation7 + $0x10] sm:$0xff]   ;;  %v1438_v41 = vld [vmem:[#allocation7 + $0x18] sm:$0xff]   ;;  %v1444_v42 = vld [vmem:[#allocation7 + $0x20] sm:$0xff]   ;;  %p1299_p10 = scmp.ne.s32.totalorder %s888_s6, %s1298_s8  ;;  %p1303_p11 = scmp.lt.s32.totalorder %s888_s6, %s888_s6 }
  0x3c   :  { %v97_v22 = vpack.c.bf16 %v82_v13, %v81_v12  ;;  %145 = vmatpush1.bf16.msra.mxu0 %v91_v21  ;;  %899 = vmatprep.subr.msk.bf16.mxu1 %vm88_vm0, %v101_v17  ;;  %v119_v27 = vmul.f32 %v113_v15, %v110_v9  ;;  %v120_v28 = vmul.f32 %v114_v16, %v111_v14  ;;  %v1450_v43 = vld [vmem:[#allocation7 + $0x28] sm:$0xff]   ;;  %v1456_v44 = vld [vmem:[#allocation7 + $0x30] sm:$0xff]   ;;  %v1462_v45 = vld [vmem:[#allocation7 + $0x38] sm:$0xff]   ;;  %vm1335_vm1 = vmmov 0   ;;  %p1304_p12 = scmp.lt.s32.totalorder %s1302_s9, %s1298_s8 }
  0x3d   :  { %v129_v26 = vpack.c.bf16 %v116_v20, %v115_v19  ;;  %901 = vmatprep.subr.msk.bf16.mxu0 %vm88_vm0, %v121_v18  ;;  %v107_v30 = vsel %vm88_vm0, %v105_v23, 0  ;;  %v117_v31 = vmul.f32 %v113_v15, %v113_v15  ;;  %v118_v33 = vmul.f32 %v114_v16, %v114_v16 }
  0x3e   :  { %v99_v29 = vsel %vm88_vm0, %v97_v22, 0  ;;  %v137_v32 = vpack.c.bf16 %v120_v28, %v119_v27  ;;  %v127_v34 = vsel %vm88_vm0, %v125_v24, 0  ;;  %vm630_vm3 = vcmask 1045504   ;;  %p1305_p13 = por %p1304_p12, %p1303_p11 }
  0x3f   :  { %186 = vmatpush1.bf16.msra.mxu1 %v99_v29  ;;  %898 = vmatmul.mubr.msk.bf16.vlgmr.msra.gmra.mrb[0].mxu0 %vm88_vm0, %v60_v25  ;;  %v133_v35 = vpack.c.bf16 %v118_v33, %v117_v31 }
  0x40   :  { %903 = vmatprep.subr.msk.bf16.mxu1 %vm88_vm0, %v129_v26  ;;  %227 = vmatpush1.bf16.msra.mxu0 %v107_v30  ;;  %p1306_p0 = pnand %p1305_p13, %p1299_p10 }
  0x41   :  { %258 = vmatprep.mubr.bf16.mxu0 %v1333_v0  ;;  %905 = vmatprep.subr.msk.bf16.mxu0 %vm88_vm0, %v137_v32  ;;  %v135_v37 = vsel %vm88_vm0, %v133_v35, 0 }
  0x42   :  { %900 = vmatmul.mubr.msk.bf16.vlgmr.msra.gmra.mrb[0].mxu1 %vm88_vm0, %v60_v25 }
  0x43   :  { %268 = vmatpush1.bf16.msra.mxu1 %v127_v34  ;;  %299 = vmatprep.mubr.bf16.mxu1 %v1333_v0 }
  0x44   :  { %1005 = vmatprep.subr.bf16.mxu1 %v1334_v36 }
  0x47   :  { %902 = vmatmul.mubr.msk.bf16.vlgmr.msra.gmra.mrb[4].mxu0 %vm88_vm0, %v60_v25 }
  0x48   :  { %309 = vmatpush1.bf16.msra.mxu0 %v135_v37  ;;  %340 = vmatprep.mubr.bf16.mxu0 %v1333_v0 }
  0x49   :  { %1025 = vmatprep.subr.bf16.mxu0 %v1334_v36 }
  0x4a   :  { %904 = vmatmul.mubr.msk.bf16.vlgmr.msra.gmra.mrb[4].mxu1 %vm88_vm0, %v60_v25 }
  0x4b   :  { %1006 = vmatpush3.bf16.msra.mxu1 %v1421_v38  ;;  %1021 = vmatprep.mubr.msk.bf16.mxu1 %vm1335_vm1, %v1334_v36 }
  0x4c   :  { %1007 = vmatprep.subr.bf16.mxu1 %v1334_v36 }
  0x4f   :  { %1008 = vmatpush3.bf16.msra.mxu1 %v1427_v39  ;;  %906 = vmatmul.mubr.msk.bf16.vlgmr.msra.gmra.mrb[8].mxu0 %vm88_vm0, %v60_v25 }
  0x50   :  { %1009 = vmatprep.subr.bf16.mxu1 %v1334_v36  ;;  %1026 = vmatpush3.bf16.msra.mxu0 %v1421_v38 }
  0x51   :  { %1027 = vmatprep.subr.bf16.mxu0 %v1334_v36  ;;  %1041 = vmatprep.mubr.msk.bf16.mxu0 %vm1335_vm1, %v1334_v36 }
  0x53   :  { %1010 = vmatpush3.bf16.msra.mxu1 %v1431_v40 }
  0x54   :  { %1011 = vmatprep.subr.bf16.mxu1 %v1334_v36  ;;  %1028 = vmatpush3.bf16.msra.mxu0 %v1427_v39 }
  0x55   :  { %1029 = vmatprep.subr.bf16.mxu0 %v1334_v36 }
  0x57   :  { %1012 = vmatpush3.bf16.msra.mxu1 %v1438_v41 }
  0x58   :  { %1013 = vmatprep.subr.bf16.mxu1 %v1334_v36  ;;  %1030 = vmatpush3.bf16.msra.mxu0 %v1431_v40 }
  0x59   :  { %1031 = vmatprep.subr.bf16.mxu0 %v1334_v36 }
  0x5b   :  { %1014 = vmatpush3.bf16.msra.mxu1 %v1444_v42 }
  0x5c   :  { %1015 = vmatprep.subr.bf16.mxu1 %v1334_v36  ;;  %1032 = vmatpush3.bf16.msra.mxu0 %v1438_v41 }
  0x5d   :  { %1033 = vmatprep.subr.bf16.mxu0 %v1334_v36 }
  0x5f   :  { %1016 = vmatpush3.bf16.msra.mxu1 %v1450_v43 }
  0x60   :  { %1017 = vmatprep.subr.bf16.mxu1 %v1334_v36  ;;  %1034 = vmatpush3.bf16.msra.mxu0 %v1444_v42 }
  0x61   :  { %1035 = vmatprep.subr.bf16.mxu0 %v1334_v36 }
  0x63   :  { %1018 = vmatpush3.bf16.msra.mxu1 %v1456_v44 }
  0x64   :  { %1019 = vmatprep.subr.bf16.mxu1 %v1334_v36  ;;  %1036 = vmatpush3.bf16.msra.mxu0 %v1450_v43 }
  0x65   :  { %1037 = vmatprep.subr.bf16.mxu0 %v1334_v36 }
  0x67   :  { %1020 = vmatpush3.bf16.msra.mxu1 %v1462_v45 }
  0x68   :  { %1045 = vmatprep.subr.bf16.mxu1 %v1334_v36  ;;  %1038 = vmatpush3.bf16.msra.mxu0 %v1456_v44 }
  0x69   :  { %1039 = vmatprep.subr.bf16.mxu0 %v1334_v36 }
  0x6c   :  { %1040 = vmatpush3.bf16.msra.mxu0 %v1462_v45 }
  0x6d   :  { %1065 = vmatprep.subr.bf16.mxu0 %v1334_v36 }
 0x112   :  { %v178_v46 = vpop.f32.mrb[0].mxu0 }
 0x113   :  { %v349_v47 = vpack.c.bf16 %v178_v46, %v178_v46  ;;  %v180_v48 = vpop.f32.mrb[1].mxu0 }
 0x114   :  { %v350_v49 = vpack.c.bf16 %v180_v48, %v180_v48  ;;  %v182_v50 = vpop.f32.mrb[2].mxu0 }
 0x115   :  { %v219_v51 = vpop.f32.mrb[0].mxu1  ;;  %v183_v52 = vpop.f32.mrb[3].mxu0  ;;  %1022 = vmatmul.mubr.bf16.vlgmr.msra.gmra.mrb[8].mxu1 %v349_v47 }
 0x116   :  { %v221_v53 = vpop.f32.mrb[1].mxu1  ;;  %1046 = vmatpush3.bf16.msra.mxu1 %v1421_v38  ;;  %1042 = vmatmul.mubr.bf16.vlgmr.msra.gmra.mrb[12].mxu0 %v350_v49  ;;  %v351_v4 = vpack.c.bf16 %v219_v51, %v219_v51 }
 0x117   :  { %v223_v54 = vpop.f32.mrb[2].mxu1  ;;  %1066 = vmatpush3.bf16.msra.mxu0 %v1421_v38  ;;  %1047 = vmatprep.subr.bf16.mxu1 %v1334_v36  ;;  %v352_v5 = vpack.c.bf16 %v221_v53, %v221_v53 }
 0x118   :  { %v224_v55 = vpop.f32.mrb[3].mxu1  ;;  %1067 = vmatprep.subr.bf16.mxu0 %v1334_v36  ;;  %1061 = vmatprep.mubr.msk.bf16.mxu1 %vm1335_vm1, %v1334_v36 }
 0x119   :  { %1081 = vmatprep.mubr.msk.bf16.mxu0 %vm1335_vm1, %v1334_v36 }
 0x11a   :  { %1048 = vmatpush3.bf16.msra.mxu1 %v1427_v39  ;;  %v1486_v56 = vpop.f32.mrb[4].mxu0 }
 0x11b   :  { %1068 = vmatpush3.bf16.msra.mxu0 %v1427_v39  ;;  %1049 = vmatprep.subr.bf16.mxu1 %v1334_v36  ;;  %v1490_v57 = vpop.f32.mrb[5].mxu0  ;;  %v353_v6 = vpack.c.bf16 %v1486_v56, %v1486_v56 }
 0x11c   :  { %1069 = vmatprep.subr.bf16.mxu0 %v1334_v36  ;;  %v264_v58 = vpop.f32.mrb[6].mxu0  ;;  %v354_v7 = vpack.c.bf16 %v1490_v57, %v1490_v57 }
 0x11d   :  { %v1493_v59 = vpop.f32.mrb[4].mxu1  ;;  %v265_v60 = vpop.f32.mrb[7].mxu0 }
 0x11e   :  { %v1495_v61 = vpop.f32.mrb[5].mxu1  ;;  %1050 = vmatpush3.bf16.msra.mxu1 %v1431_v40  ;;  %v355_v8 = vpack.c.bf16 %v1493_v59, %v1493_v59 }
 0x11f   :  { %v305_v62 = vpop.f32.mrb[6].mxu1  ;;  %1070 = vmatpush3.bf16.msra.mxu0 %v1431_v40  ;;  %1051 = vmatprep.subr.bf16.mxu1 %v1334_v36  ;;  %v356_v9 = vpack.c.bf16 %v1495_v61, %v1495_v61 }
 0x120   :  { %v306_v63 = vpop.f32.mrb[7].mxu1  ;;  %1071 = vmatprep.subr.bf16.mxu0 %v1334_v36 }
 0x122   :  { %1052 = vmatpush3.bf16.msra.mxu1 %v1438_v41  ;;  %v1502_v0 = vpop.f32.mrb[8].mxu0 }
 0x123   :  { %1072 = vmatpush3.bf16.msra.mxu0 %v1438_v41  ;;  %1053 = vmatprep.subr.bf16.mxu1 %v1334_v36  ;;  %v1506_v1 = vpop.f32.mrb[9].mxu0  ;;  %v357_v10 = vpack.c.bf16 %v1502_v0, %v1502_v0 }
 0x124   :  { %1073 = vmatprep.subr.bf16.mxu0 %v1334_v36  ;;  %v346_v2 = vpop.f32.mrb[10].mxu0  ;;  %v358_v11 = vpack.c.bf16 %v1506_v1, %v1506_v1 }
 0x125   :  { %v347_v3 = vpop.f32.mrb[11].mxu0 }
 0x126   :  { %1054 = vmatpush3.bf16.msra.mxu1 %v1444_v42 }
 0x127   :  { %1074 = vmatpush3.bf16.msra.mxu0 %v1444_v42  ;;  %1055 = vmatprep.subr.bf16.mxu1 %v1334_v36 }
 0x128   :  { %1075 = vmatprep.subr.bf16.mxu0 %v1334_v36 }
 0x12a   :  { %1056 = vmatpush3.bf16.msra.mxu1 %v1450_v43 }
 0x12b   :  { %1076 = vmatpush3.bf16.msra.mxu0 %v1450_v43  ;;  %1057 = vmatprep.subr.bf16.mxu1 %v1334_v36 }
 0x12c   :  { %1077 = vmatprep.subr.bf16.mxu0 %v1334_v36 }
 0x12e   :  { %1058 = vmatpush3.bf16.msra.mxu1 %v1456_v44 }
 0x12f   :  { %1078 = vmatpush3.bf16.msra.mxu0 %v1456_v44  ;;  %1059 = vmatprep.subr.bf16.mxu1 %v1334_v36 }
 0x130   :  { %1079 = vmatprep.subr.bf16.mxu0 %v1334_v36 }
 0x132   :  { %1060 = vmatpush3.bf16.msra.mxu1 %v1462_v45 }
 0x133   :  { %1080 = vmatpush3.bf16.msra.mxu0 %v1462_v45  ;;  %1085 = vmatprep.subr.bf16.mxu1 %v1334_v36 }
 0x134   :  { %1105 = vmatprep.subr.bf16.mxu0 %v1334_v36 }
 0x135   :  { %1062 = vmatmul.mubr.bf16.vlgmr.msra.gmra.mrb[12].mxu1 %v351_v4 }
 0x136   :  { %1082 = vmatmul.mubr.bf16.vlgmr.msra.gmra.mrb[16].mxu0 %v352_v5  ;;  %1086 = vmatpush3.bf16.msra.mxu1 %v1421_v38 }
 0x137   :  { %1106 = vmatpush3.bf16.msra.mxu0 %v1421_v38  ;;  %1087 = vmatprep.subr.bf16.mxu1 %v1334_v36 }
 0x138   :  { %1107 = vmatprep.subr.bf16.mxu0 %v1334_v36  ;;  %1101 = vmatprep.mubr.msk.bf16.mxu1 %vm1335_vm1, %v1334_v36 }
 0x139   :  { %1121 = vmatprep.mubr.msk.bf16.mxu0 %vm1335_vm1, %v1334_v36 }
 0x13a   :  { %1088 = vmatpush3.bf16.msra.mxu1 %v1427_v39 }
 0x13b   :  { %1108 = vmatpush3.bf16.msra.mxu0 %v1427_v39  ;;  %1089 = vmatprep.subr.bf16.mxu1 %v1334_v36 }
 0x13c   :  { %1109 = vmatprep.subr.bf16.mxu0 %v1334_v36 }
 0x13e   :  { %1090 = vmatpush3.bf16.msra.mxu1 %v1431_v40 }
 0x13f   :  { %1110 = vmatpush3.bf16.msra.mxu0 %v1431_v40  ;;  %1091 = vmatprep.subr.bf16.mxu1 %v1334_v36 }
 0x140   :  { %1111 = vmatprep.subr.bf16.mxu0 %v1334_v36 }
 0x142   :  { %1092 = vmatpush3.bf16.msra.mxu1 %v1438_v41 }
 0x143   :  { %1112 = vmatpush3.bf16.msra.mxu0 %v1438_v41  ;;  %1093 = vmatprep.subr.bf16.mxu1 %v1334_v36 }
 0x144   :  { %1113 = vmatprep.subr.bf16.mxu0 %v1334_v36 }
 0x146   :  { %1094 = vmatpush3.bf16.msra.mxu1 %v1444_v42 }
 0x147   :  { %1114 = vmatpush3.bf16.msra.mxu0 %v1444_v42  ;;  %1095 = vmatprep.subr.bf16.mxu1 %v1334_v36 }
 0x148   :  { %1115 = vmatprep.subr.bf16.mxu0 %v1334_v36 }
 0x14a   :  { %1096 = vmatpush3.bf16.msra.mxu1 %v1450_v43 }
 0x14b   :  { %1116 = vmatpush3.bf16.msra.mxu0 %v1450_v43  ;;  %1097 = vmatprep.subr.bf16.mxu1 %v1334_v36 }
 0x14c   :  { %1117 = vmatprep.subr.bf16.mxu0 %v1334_v36 }
 0x14e   :  { %1098 = vmatpush3.bf16.msra.mxu1 %v1456_v44 }
 0x14f   :  { %1118 = vmatpush3.bf16.msra.mxu0 %v1456_v44  ;;  %1099 = vmatprep.subr.bf16.mxu1 %v1334_v36 }
 0x150   :  { %1119 = vmatprep.subr.bf16.mxu0 %v1334_v36 }
 0x152   :  { %1100 = vmatpush3.bf16.msra.mxu1 %v1462_v45 }
 0x153   :  { %1120 = vmatpush3.bf16.msra.mxu0 %v1462_v45  ;;  %1125 = vmatprep.subr.bf16.mxu1 %v1334_v36 }
 0x154   :  { %1145 = vmatprep.subr.bf16.mxu0 %v1334_v36 }
 0x155   :  { %1102 = vmatmul.mubr.bf16.vlgmr.msra.gmra.mrb[16].mxu1 %v353_v6 }
 0x156   :  { %1122 = vmatmul.mubr.bf16.vlgmr.msra.gmra.mrb[20].mxu0 %v354_v7  ;;  %1126 = vmatpush3.bf16.msra.mxu1 %v1421_v38 }
 0x157   :  { %1146 = vmatpush3.bf16.msra.mxu0 %v1421_v38  ;;  %1127 = vmatprep.subr.bf16.mxu1 %v1334_v36 }
 0x158   :  { %1147 = vmatprep.subr.bf16.mxu0 %v1334_v36  ;;  %1141 = vmatprep.mubr.msk.bf16.mxu1 %vm1335_vm1, %v1334_v36 }
 0x159   :  { %1161 = vmatprep.mubr.msk.bf16.mxu0 %vm1335_vm1, %v1334_v36 }
 0x15a   :  { %1128 = vmatpush3.bf16.msra.mxu1 %v1427_v39 }
 0x15b   :  { %1148 = vmatpush3.bf16.msra.mxu0 %v1427_v39  ;;  %1129 = vmatprep.subr.bf16.mxu1 %v1334_v36 }
 0x15c   :  { %1149 = vmatprep.subr.bf16.mxu0 %v1334_v36 }
 0x15e   :  { %1130 = vmatpush3.bf16.msra.mxu1 %v1431_v40 }
 0x15f   :  { %1150 = vmatpush3.bf16.msra.mxu0 %v1431_v40  ;;  %1131 = vmatprep.subr.bf16.mxu1 %v1334_v36 }
 0x160   :  { %1151 = vmatprep.subr.bf16.mxu0 %v1334_v36 }
 0x162   :  { %1132 = vmatpush3.bf16.msra.mxu1 %v1438_v41 }
 0x163   :  { %1152 = vmatpush3.bf16.msra.mxu0 %v1438_v41  ;;  %1133 = vmatprep.subr.bf16.mxu1 %v1334_v36 }
 0x164   :  { %1153 = vmatprep.subr.bf16.mxu0 %v1334_v36 }
 0x166   :  { %1134 = vmatpush3.bf16.msra.mxu1 %v1444_v42 }
 0x167   :  { %1154 = vmatpush3.bf16.msra.mxu0 %v1444_v42  ;;  %1135 = vmatprep.subr.bf16.mxu1 %v1334_v36 }
 0x168   :  { %1155 = vmatprep.subr.bf16.mxu0 %v1334_v36 }
 0x16a   :  { %1136 = vmatpush3.bf16.msra.mxu1 %v1450_v43 }
 0x16b   :  { %1156 = vmatpush3.bf16.msra.mxu0 %v1450_v43  ;;  %1137 = vmatprep.subr.bf16.mxu1 %v1334_v36 }
 0x16c   :  { %1157 = vmatprep.subr.bf16.mxu0 %v1334_v36 }
 0x16e   :  { %1138 = vmatpush3.bf16.msra.mxu1 %v1456_v44 }
 0x16f   :  { %1158 = vmatpush3.bf16.msra.mxu0 %v1456_v44  ;;  %1139 = vmatprep.subr.bf16.mxu1 %v1334_v36 }
 0x170   :  { %1159 = vmatprep.subr.bf16.mxu0 %v1334_v36 }
 0x172   :  { %1140 = vmatpush3.bf16.msra.mxu1 %v1462_v45 }
 0x173   :  { %1160 = vmatpush3.bf16.msra.mxu0 %v1462_v45  ;;  %1165 = vmatprep.subr.bf16.mxu1 %v1334_v36 }
 0x174   :  { %1185 = vmatprep.subr.bf16.mxu0 %v1334_v36 }
 0x175   :  { %1142 = vmatmul.mubr.bf16.vlgmr.msra.gmra.mrb[20].mxu1 %v355_v8 }
 0x176   :  { %1162 = vmatmul.mubr.bf16.vlgmr.msra.gmra.mrb[24].mxu0 %v356_v9  ;;  %1166 = vmatpush3.bf16.msra.mxu1 %v1421_v38 }
 0x177   :  { %1186 = vmatpush3.bf16.msra.mxu0 %v1421_v38  ;;  %1167 = vmatprep.subr.bf16.mxu1 %v1334_v36 }
 0x178   :  { %1187 = vmatprep.subr.bf16.mxu0 %v1334_v36  ;;  %1181 = vmatprep.mubr.msk.bf16.mxu1 %vm1335_vm1, %v1334_v36 }
 0x179   :  { %1201 = vmatprep.mubr.msk.bf16.mxu0 %vm1335_vm1, %v1334_v36 }
 0x17a   :  { %1168 = vmatpush3.bf16.msra.mxu1 %v1427_v39 }
 0x17b   :  { %1188 = vmatpush3.bf16.msra.mxu0 %v1427_v39  ;;  %1169 = vmatprep.subr.bf16.mxu1 %v1334_v36  ;;  %v359_v39 = vlaneseq }
 0x17c   :  { %1189 = vmatprep.subr.bf16.mxu0 %v1334_v36 }
 0x17d   :  { %v360_v50 = vand.u32 127, %v359_v39 }
 0x17e   :  { %1170 = vmatpush3.bf16.msra.mxu1 %v1431_v40 }
 0x17f   :  { %1190 = vmatpush3.bf16.msra.mxu0 %v1431_v40  ;;  %1171 = vmatprep.subr.bf16.mxu1 %v1334_v36  ;;  %vm361_vm2 = vcmp.lt.s32.totalorder %v360_v50, 6 }
 0x180   :  { %1191 = vmatprep.subr.bf16.mxu0 %v1334_v36 }
 0x182   :  { %1172 = vmatpush3.bf16.msra.mxu1 %v1438_v41 }
 0x183   :  { %1192 = vmatpush3.bf16.msra.mxu0 %v1438_v41  ;;  %1173 = vmatprep.subr.bf16.mxu1 %v1334_v36 }
 0x184   :  { %1193 = vmatprep.subr.bf16.mxu0 %v1334_v36 }
 0x186   :  { %1174 = vmatpush3.bf16.msra.mxu1 %v1444_v42 }
 0x187   :  { %1194 = vmatpush3.bf16.msra.mxu0 %v1444_v42  ;;  %1175 = vmatprep.subr.bf16.mxu1 %v1334_v36 }
 0x188   :  { %1195 = vmatprep.subr.bf16.mxu0 %v1334_v36 }
 0x18a   :  { %1176 = vmatpush3.bf16.msra.mxu1 %v1450_v43 }
 0x18b   :  { %1196 = vmatpush3.bf16.msra.mxu0 %v1450_v43  ;;  %1177 = vmatprep.subr.bf16.mxu1 %v1334_v36 }
 0x18c   :  { %1197 = vmatprep.subr.bf16.mxu0 %v1334_v36 }
 0x18e   :  { %1178 = vmatpush3.bf16.msra.mxu1 %v1456_v44 }
 0x18f   :  { %1198 = vmatpush3.bf16.msra.mxu0 %v1456_v44  ;;  %1179 = vmatprep.subr.bf16.mxu1 %v1334_v36 }
 0x190   :  { %1199 = vmatprep.subr.bf16.mxu0 %v1334_v36 }
 0x192   :  { %1180 = vmatpush3.bf16.msra.mxu1 %v1462_v45 }
 0x193   :  { %1200 = vmatpush3.bf16.msra.mxu0 %v1462_v45 }
 0x195   :  { %1182 = vmatmul.mubr.bf16.vlgmr.msra.gmra.mrb[24].mxu1 %v357_v10 }
 0x196   :  { %1202 = vmatmul.mubr.bf16.vlgmr.msra.gmra.mrb[28].mxu0 %v358_v11 }
 0x1e8   :  { %v445_v12 = vpop.f32.mrb[8].mxu1 }
 0x1e9   :  { %v611_v13 = vmul.f32 %v445_v12, %v445_v12  ;;  %v1023_v14 = vpop.f32.mrb[9].mxu1  ;;  %v485_v15 = vpop.f32.mrb[12].mxu0 }
 0x1ea   :  { %v612_v16 = vmul.f32 %v485_v15, %v485_v15  ;;  %v613_v17 = vmul.f32 %v485_v15, %v445_v12  ;;  %v448_v18 = vpop.f32.mrb[10].mxu1  ;;  %v1043_v19 = vpop.f32.mrb[13].mxu0 }
 0x1eb   :  { %v1024_v20 = vpop.f32.mrb[11].mxu1  ;;  %v488_v21 = vpop.f32.mrb[14].mxu0 }
 0x1ec   :  { %v622_v22 = vadd.f32 %v612_v16, %v611_v13  ;;  %v1044_v23 = vpop.f32.mrb[15].mxu0  ;;  %v617_v40 = vmul.f32 2.0, %v613_v17 }
 0x1ee   :  { %v623_v35 = vadd.f32 0.0001, %v622_v22  ;;  %v618_v51 = vadd.f32 0.0001, %v617_v40 }
 0x208   :  { %v525_v24 = vpop.f32.mrb[12].mxu1 }
 0x209   :  { %v614_v25 = vsub.f32 %v525_v24, %v611_v13  ;;  %v1063_v26 = vpop.f32.mrb[13].mxu1  ;;  %v565_v27 = vpop.f32.mrb[16].mxu0 }
 0x20a   :  { %v615_v28 = vsub.f32 %v565_v27, %v612_v16  ;;  %v528_v29 = vpop.f32.mrb[14].mxu1  ;;  %v1083_v30 = vpop.f32.mrb[17].mxu0 }
 0x20b   :  { %v1064_v31 = vpop.f32.mrb[15].mxu1  ;;  %v568_v32 = vpop.f32.mrb[18].mxu0 }
 0x20c   :  { %v624_v33 = vadd.f32 %v615_v28, %v614_v25  ;;  %v1084_v34 = vpop.f32.mrb[19].mxu0 }
 0x20e   :  { %v625_v36 = vadd.f32 0.0009, %v624_v33 }
 0x210   :  { %v626_v37 = vmul.f32 %v625_v36, %v623_v35 }
 0x212   :  { %1228 = vrcp.f32 %v626_v37 }
 0x21c   :  { %v1229_v54 = vpop.eup %1228 }
 0x228   :  { %v605_v38 = vpop.f32.mrb[16].mxu1 }
 0x229   :  { %v616_v41 = vsub.f32 %v605_v38, %v613_v17  ;;  %v1103_v42 = vpop.f32.mrb[17].mxu1  ;;  %v679_v43 = vpop.f32.mrb[20].mxu0 }
 0x22a   :  { %v608_v44 = vpop.f32.mrb[18].mxu1  ;;  %v1123_v45 = vpop.f32.mrb[21].mxu0  ;;  %v845_v58 = vmul.f32 %v679_v43, %v679_v43 }
 0x22b   :  { %v619_v46 = vmul.f32 2.0, %v616_v41  ;;  %v1104_v47 = vpop.f32.mrb[19].mxu1  ;;  %v682_v48 = vpop.f32.mrb[22].mxu0 }
 0x22c   :  { %v1124_v49 = vpop.f32.mrb[23].mxu0 }
 0x22d   :  { %v620_v52 = vadd.f32 0.0009, %v619_v46 }
 0x22f   :  { %v621_v53 = vmul.f32 %v620_v52, %v618_v51 }
 0x231   :  { %v628_v55 = vmul.f32 %v1229_v54, %v621_v53 }
 0x233   :  { %v629_v56 = vsel %vm361_vm2, %v628_v55, 0.0 }
 0x234   :  { %v631_v57 = vsel %vm630_vm3, %v629_v56, 0.0 }
 0x235   :  { %632 = vadd.xlane.f32.xlu0 %v631_v57 }
 0x248   :  { %v719_v59 = vpop.f32.mrb[20].mxu1 }
 0x249   :  { %v846_v60 = vmul.f32 %v719_v59, %v719_v59  ;;  %v847_v61 = vmul.f32 %v719_v59, %v679_v43  ;;  %v1143_v62 = vpop.f32.mrb[21].mxu1  ;;  %v759_v63 = vpop.f32.mrb[24].mxu0 }
 0x24a   :  { %v848_v0 = vsub.f32 %v759_v63, %v845_v58  ;;  %v722_v1 = vpop.f32.mrb[22].mxu1  ;;  %v1163_v2 = vpop.f32.mrb[25].mxu0 }
 0x24b   :  { %v856_v3 = vadd.f32 %v846_v60, %v845_v58  ;;  %v1144_v4 = vpop.f32.mrb[23].mxu1  ;;  %v762_v5 = vpop.f32.mrb[26].mxu0  ;;  %v851_v11 = vmul.f32 2.0, %v847_v61 }
 0x24c   :  { %v1164_v6 = vpop.f32.mrb[27].mxu0 }
 0x24d   :  { %v857_v20 = vadd.f32 0.0001, %v856_v3  ;;  %v852_v22 = vadd.f32 0.0001, %v851_v11 }
 0x268   :  { %v799_v7 = vpop.f32.mrb[24].mxu1 }
 0x269   :  { %v849_v8 = vsub.f32 %v799_v7, %v846_v60  ;;  %v1183_v9 = vpop.f32.mrb[25].mxu1  ;;  %v839_v10 = vpop.f32.mrb[28].mxu0 }
 0x26a   :  { %v850_v12 = vsub.f32 %v839_v10, %v847_v61  ;;  %v802_v13 = vpop.f32.mrb[26].mxu1  ;;  %v1203_v14 = vpop.f32.mrb[29].mxu0 }
 0x26b   :  { %v858_v15 = vadd.f32 %v849_v8, %v848_v0  ;;  %v1184_v16 = vpop.f32.mrb[27].mxu1  ;;  %v842_v17 = vpop.f32.mrb[30].mxu0 }
 0x26c   :  { %v853_v18 = vmul.f32 2.0, %v850_v12  ;;  %v1204_v19 = vpop.f32.mrb[31].mxu0 }
 0x26d   :  { %v859_v21 = vadd.f32 0.0009, %v858_v15 }
 0x26e   :  { %v854_v23 = vadd.f32 0.0009, %v853_v18 }
 0x26f   :  { %v860_v24 = vmul.f32 %v859_v21, %v857_v20 }
 0x270   :  { %v855_v25 = vmul.f32 %v854_v23, %v852_v22 }
 0x271   :  { %1230 = vrcp.f32 %v860_v24 }
 0x27b   :  { %v1231_v26 = vpop.eup %1230 }
 0x27c   :  { %v862_v27 = vmul.f32 %v1231_v26, %v855_v25 }
 0x27e   :  { %v863_v28 = vsel %vm361_vm2, %v862_v27, 0.0 }
 0x27f   :  { %v864_v29 = vsel %vm630_vm3, %v863_v28, 0.0 }
 0x280   :  { %865 = vadd.xlane.f32.xlu0 %v864_v29 }
 0x2c2   :  { %v633_v30 = vpop.xlane.xlu0 %632 }
 0x2c3   :  { %v634_v31 = vrot.slane %v633_v30, 4 }
 0x2c5   :  { %v635_v32 = vadd.f32 %v634_v31, %v633_v30 }
 0x2c7   :  { %v636_v33 = vrot.slane %v635_v32, 2 }
 0x2c9   :  { %v637_v34 = vadd.f32 %v636_v33, %v635_v32 }
 0x2cb   :  { %v638_v35 = vrot.slane %v637_v34, 1 }
 0x2cd   :  { %v639_v36 = vadd.f32 %v638_v35, %v637_v34 }
 0x2cf   :  { %1205 = vpush %v639_v36 }
 0x300   :  { %s1206_s2 = spop %1205 }
 0x301   :  { %s641_s28 = smul.f32 0.027777778, %s1206_s2 }
 0x30d   :  { %v866_v37 = vpop.xlane.xlu0 %865 }
 0x30e   :  { %v867_v38 = vrot.slane %v866_v37, 4 }
 0x310   :  { %v868_v39 = vadd.f32 %v867_v38, %v866_v37 }
 0x312   :  { %v869_v40 = vrot.slane %v868_v39, 2 }
 0x314   :  { %v870_v41 = vadd.f32 %v869_v40, %v868_v39 }
 0x316   :  { %v871_v42 = vrot.slane %v870_v41, 1 }
 0x318   :  { %v872_v43 = vadd.f32 %v871_v42, %v870_v41 }
 0x31a   :  { %1207 = vpush %v872_v43 }
 0x34b   :  { %s1208_s29 = spop %1207 }
 0x34c   :  { %s874_s30 = smul.f32 0.027777778, %s1208_s29 }
 0x34e   :  { %s878_s7 = sadd.f32 %s874_s30, %s641_s28 }
 0x350   :  { %v879_v44 = vstv %s878_s7 }
 0x351   :  { %880 = vst [vmem:[#allocation8] sm:$0x1] %v879_v44 }
 0x352   :  { %1309 = shalt.err (!%p1306_p0)
}
 0x353   :  { %s1310_s12 = scalar_lea.hbm %s1663_s4, 16 }
 0x354   :  { %p1311_p1 = scmp.ne.s32.totalorder %s1663_s4, %s1310_s12  ;;  %p1314_p2 = scmp.lt.u32.totalorder %s1310_s12, %s1663_s4 }
 0x356   :  { %p1316_p3 = pnand %p1314_p2, %p1311_p1 }
 0x358   :  { %1319 = shalt.err (!%p1316_p3)
}
 0x359   :  { %890 = dma.vmem_to_hbm [thread:$0]  %s888_s6, 16, %s1663_s4, [#allocation4]  }
 0x35a   :  { %1324 = dma.done.wait [#allocation4], 16  }
 0x35b   :  { %1325 = vsyncadd [#allocation4], 4294967280 }
 0x35c   :  { %894 = vsyncpa [#allocation3], 1 }
 0x35d   :  { %895 = vsyncpa [#allocation6], 1 }
 0x35e   :  { %896 = vsyncpa [#allocation4], 1 }

</bundles_post_ra>
